<compile_context>
chip_gen: v6e
topology: v6e:2x2x1
jax: 0.10.0
libtpu: 0.0.40
codegen_flags: <defaults>
</compile_context>

<pallas_src>
import functools

import jax
import jax.numpy as jnp
from jax.experimental import pallas as pl
from jax.experimental.pallas import tpu as pltpu


def attention_kernel(dec_ref, enc_ref, w_ref, bv_ref, out_ref, *, S, B, H, Hd):
    # dec_ref : [B, Hd]        decoder hidden state
    # enc_ref : [S*B, He]      encoder outputs, seq-major flat (row = s*B + b)
    # w_ref   : [Hd+He, H]     attn.weight^T  (rows 0:Hd act on dec, rows Hd: act on enc)
    # bv_ref  : [2, H]         row 0 = attn.bias, row 1 = v.weight
    # out_ref : [B, S]         softmax attention weights (lane-dense, final layout)

    # Free static views of the packed parameters.
    w_dec = w_ref[0:Hd, :]                                               # [Hd, H]
    w_enc = w_ref[Hd:, :]                                                # [He, H]
    bias = bv_ref[0:1, :]                                                # [1, H]
    v = bv_ref[1:2, :]                                                   # [1, H]

    # Single lane-dense 2-D MXU matmul over the large operand (no batching, no .T).
    enc_part = jnp.dot(enc_ref[...], w_enc,
                       preferred_element_type=jnp.float32)               # [S*B, H]

    # Hoisted dec contribution + bias: one small matmul + one [B, H] add.
    dec_part = jnp.dot(dec_ref[...], w_dec,
                       preferred_element_type=jnp.float32) + bias        # [B, H]

    # Stay in the 2-D seq-major layout [S*B, H] for the elementwise work.
    # Row r = s*B + b, so repeating the [B, H] block S times matches the ordering.
    energy = jnp.tanh(enc_part + jnp.tile(dec_part, (S, 1)))             # [S*B, H]  (EUP)

    # v-projection: VPU multiply, then reduce over H (via the proven [S,B,H] reshape).
    weighted = energy * v                                                # [S*B, H]  (VPU)
    scores_sb = jnp.sum(weighted.reshape(S, B, H), axis=-1)              # [S, B]

    # Tiny single-vreg transpose -> lane-dense [B, S] tile; softmax over the seq axis
    # on lanes; store is lane-dense (no wrapper transpose, no extra HBM round-trip).
    scores = jnp.transpose(scores_sb)                                    # [B, S]
    m = jnp.max(scores, axis=-1, keepdims=True)                          # [B, 1]
    e = jnp.exp(scores - m)
    denom = jnp.sum(e, axis=-1, keepdims=True)                           # [B, 1]
    out_ref[...] = e * pl.reciprocal(denom, approx=False)


def prepare_attention_params(w_attn, b_attn, v_w):
    """One-time parameter prep (hoisted out of the per-step forward).

    w_attn: [H, Hd+He] (nn.Linear weight), b_attn: [H], v_w: [1, H]
    returns (w_t [Hd+He, H], bv [2, H])
    """
    H = w_attn.shape[0]
    w_t = jnp.transpose(w_attn)                                          # [Hd+He, H]
    bv = jnp.concatenate([b_attn.reshape(1, H), v_w.reshape(1, H)], 0)   # [2, H]
    return w_t, bv


def attention_forward(dec_hidden, enc_outputs, w_t, bv):
    """dec_hidden: [B, Hd]; enc_outputs: [S, B, He] -> [B, S] softmax weights."""
    S, B, He = enc_outputs.shape
    Hd = dec_hidden.shape[1]
    H = w_t.shape[1]
    assert w_t.shape[0] == Hd + He and bv.shape == (2, H)

    # Free contiguous flatten — no materialized HBM transpose of the largest input.
    enc_flat = enc_outputs.reshape(S * B, He)                            # [S*B, He]

    flops = 2 * S * B * He * H + 2 * B * Hd * H + 2 * S * B * H + 6 * B * S
    transcendentals = S * B * H + B * S                                  # tanh + exp
    bytes_accessed = 4 * (dec_hidden.size + enc_flat.size + w_t.size + bv.size + B * S)

    vmem = pl.BlockSpec(memory_space=pltpu.MemorySpace.VMEM)
    # Grid-less on purpose: at S=8, B=2 the data is a few KB; per-step grid overhead
    # would exceed the compute. (Only add a grid once decode steps are batched.)
    return pl.pallas_call(
        functools.partial(attention_kernel, S=S, B=B, H=H, Hd=Hd),
        out_shape=jax.ShapeDtypeStruct((B, S), jnp.float32),
        in_specs=[vmem, vmem, vmem, vmem],
        out_specs=vmem,
        cost_estimate=pl.CostEstimate(flops=flops,
                                      transcendentals=transcendentals,
                                      bytes_accessed=bytes_accessed),
        compiler_params=pltpu.CompilerParams(),
    )(dec_hidden, enc_flat, w_t, bv)


def attention_reference(dec_hidden, enc_outputs, w_attn, b_attn, v_w):
    """Pure-JAX reference mirroring the PyTorch forward exactly."""
    S, B, _ = enc_outputs.shape
    dec_rep = jnp.repeat(dec_hidden[:, None, :], S, axis=1)              # [B, S, Hd]
    enc_b = jnp.transpose(enc_outputs, (1, 0, 2))                        # [B, S, He]
    cat = jnp.concatenate([dec_rep, enc_b], axis=2)                      # [B, S, Hd+He]
    energy = jnp.tanh(jnp.einsum("bsc,hc->bsh", cat, w_attn) + b_attn)
    attention = jnp.einsum("bsh,oh->bso", energy, v_w)[..., 0]           # [B, S]
    return jax.nn.softmax(attention, axis=1)


if __name__ == "__main__":
    enc_hidden_size = 32
    dec_hidden_size = 32
    B, S = 2, 8

    key = jax.random.PRNGKey(0)
    k1, k2, k3, k4, k5 = jax.random.split(key, 5)

    # deterministic synthetic parameters (shapes follow nn.Linear: [out, in])
    w_attn = jax.random.normal(
        k1, (dec_hidden_size, enc_hidden_size + dec_hidden_size), dtype=jnp.float32) * 0.1
    b_attn = jax.random.normal(k2, (dec_hidden_size,), dtype=jnp.float32) * 0.1
    v_w = jax.random.normal(k3, (1, dec_hidden_size), dtype=jnp.float32) * 0.1

    # example inputs
    dec_hidden = jax.random.normal(k4, (B, dec_hidden_size), dtype=jnp.float32)
    enc_outputs = jax.random.normal(k5, (S, B, enc_hidden_size), dtype=jnp.float32)

    # one-time parameter prep (hoisted out of the per-step path)
    w_t, bv = prepare_attention_params(w_attn, b_attn, v_w)

    out = attention_forward(dec_hidden, enc_outputs, w_t, bv)
    out = jax.block_until_ready(out)

    ref = attention_reference(dec_hidden, enc_outputs, w_attn, b_attn, v_w)
    assert out.shape == (B, S)
    assert jnp.allclose(out, ref, atol=1e-5, rtol=1e-5), "mismatch vs reference"
    assert jnp.allclose(jnp.sum(out, axis=1), 1.0, atol=1e-5), "softmax rows must sum to 1"

    print("KERNEL_OK")
</pallas_src>

<mosaic_0001>
module attributes {stable_mosaic.version = 11 : i64} {
  func.func @attention_kernel(%arg0: memref<2x32xf32, #tpu.memory_space<vmem>>, %arg1: memref<16x32xf32, #tpu.memory_space<vmem>>, %arg2: memref<64x32xf32, #tpu.memory_space<vmem>>, %arg3: memref<2x32xf32, #tpu.memory_space<vmem>>, %arg4: memref<2x8xf32, #tpu.memory_space<vmem>>) attributes {dimension_semantics = [], scalar_prefetch = 0 : i64, scratch_operands = 0 : i64, tpu.core_type = #tpu.core_type<tc>} {
    %c0 = arith.constant 0 : index
    %c0_0 = arith.constant 0 : index
    %0 = vector.load %arg2[%c0, %c0_0] : memref<64x32xf32, #tpu.memory_space<vmem>>, vector<32x32xf32>
    %c32 = arith.constant 32 : index
    %c0_1 = arith.constant 0 : index
    %1 = vector.load %arg2[%c32, %c0_1] : memref<64x32xf32, #tpu.memory_space<vmem>>, vector<32x32xf32>
    %c0_2 = arith.constant 0 : index
    %c0_3 = arith.constant 0 : index
    %2 = vector.load %arg3[%c0_2, %c0_3] : memref<2x32xf32, #tpu.memory_space<vmem>>, vector<1x32xf32>
    %c1 = arith.constant 1 : index
    %c0_4 = arith.constant 0 : index
    %3 = vector.load %arg3[%c1, %c0_4] : memref<2x32xf32, #tpu.memory_space<vmem>>, vector<1x32xf32>
    %c0_5 = arith.constant 0 : index
    %c0_6 = arith.constant 0 : index
    %4 = vector.load %arg1[%c0_5, %c0_6] : memref<16x32xf32, #tpu.memory_space<vmem>>, vector<16x32xf32>
    %cst = arith.constant dense<0.000000e+00> : vector<16x32xf32>
    %5 = tpu.matmul %4, %1, %cst {dimension_numbers = #tpu.dot_dimension_numbers<[1], [0], [0], [1], [0, 0, 1, 1], [], []>} : vector<16x32xf32>, vector<32x32xf32>, vector<16x32xf32> -> vector<16x32xf32>
    %c0_7 = arith.constant 0 : index
    %c0_8 = arith.constant 0 : index
    %6 = vector.load %arg0[%c0_7, %c0_8] : memref<2x32xf32, #tpu.memory_space<vmem>>, vector<2x32xf32>
    %cst_9 = arith.constant dense<0.000000e+00> : vector<2x32xf32>
    %7 = tpu.matmul %6, %0, %cst_9 {dimension_numbers = #tpu.dot_dimension_numbers<[1], [0], [0], [1], [0, 0, 1, 1], [], []>} : vector<2x32xf32>, vector<32x32xf32>, vector<2x32xf32> -> vector<2x32xf32>
    %8 = vector.broadcast %2 : vector<1x32xf32> to vector<2x32xf32>
    %9 = arith.addf %7, %8 : vector<2x32xf32>
    %10 = tpu.concatenate %9, %9, %9, %9, %9, %9, %9, %9 in 0 : vector<2x32xf32>, vector<2x32xf32>, vector<2x32xf32>, vector<2x32xf32>, vector<2x32xf32>, vector<2x32xf32>, vector<2x32xf32>, vector<2x32xf32> -> vector<16x32xf32>
    %11 = arith.addf %5, %10 : vector<16x32xf32>
    %12 = math.tanh %11 : vector<16x32xf32>
    %13 = vector.broadcast %3 : vector<1x32xf32> to vector<16x32xf32>
    %14 = arith.mulf %12, %13 : vector<16x32xf32>
    %15 = vector.shape_cast %14 : vector<16x32xf32> to vector<8x2x32xf32>
    %cst_10 = arith.constant dense<0.000000e+00> : vector<8x2xf32>
    %16 = vector.multi_reduction <add>, %15, %cst_10 [2] : vector<8x2x32xf32> to vector<8x2xf32>
    %17 = tpu.transpose %16, [1, 0] : vector<8x2xf32> -> vector<2x8xf32>
    %cst_11 = arith.constant dense<0xFF800000> : vector<2xf32>
    %18 = vector.multi_reduction <maximumf>, %17, %cst_11 [1] : vector<2x8xf32> to vector<2xf32>
    %19 = vector.shape_cast %18 : vector<2xf32> to vector<2x1xf32>
    %20 = vector.broadcast %19 : vector<2x1xf32> to vector<2x8xf32>
    %21 = arith.subf %17, %20 : vector<2x8xf32>
    %22 = math.exp %21 : vector<2x8xf32>
    %cst_12 = arith.constant dense<0.000000e+00> : vector<2xf32>
    %23 = vector.multi_reduction <add>, %22, %cst_12 [1] : vector<2x8xf32> to vector<2xf32>
    %24 = vector.shape_cast %23 : vector<2xf32> to vector<2x1xf32>
    %25 = tpu.reciprocal %24 : vector<2x1xf32> -> vector<2x1xf32>
    %26 = vector.broadcast %25 : vector<2x1xf32> to vector<2x8xf32>
    %27 = arith.mulf %22, %26 : vector<2x8xf32>
    %c0_13 = arith.constant 0 : index
    %c0_14 = arith.constant 0 : index
    %28 = vector.load %arg4[%c0_13, %c0_14] : memref<2x8xf32, #tpu.memory_space<vmem>>, vector<2x8xf32>
    tpu.vector_store %arg4[%c0_13, %c0_14], %27 {strides = array<i32>} : memref<2x8xf32, #tpu.memory_space<vmem>>, vector<2x8xf32>,
    return
  }
}

</mosaic_0001>

<bundles_post_ra>
// kernel: tpu_custom_call.1
= control target key start
LH: loop header
LB: loop body
LE: loop exit
PB: predicated region body
PF: predicated region fallthrough
CT: control target
= control target key end

     0   :  { %v468_v2 = vmov 0.0   ;;  %s560_s0 = inlined_call_operand.vmem [shape: f32[2,32], index: 0, kind: input, shape index: {}]   ;;  %s561_s1 = inlined_call_operand.vmem [shape: f32[16,32], index: 1, kind: input, shape index: {}]   ;;  %s562_s2 = inlined_call_operand.vmem [shape: f32[64,32], index: 2, kind: input, shape index: {}]   ;;  %s563_s3 = inlined_call_operand.vmem [shape: f32[2,32], index: 3, kind: input, shape index: {}]   ;;  %s564_s4 = inlined_call_operand.hbm [shape: f32[2,8], index: 4, kind: output, shape index: {}]  }
   0x1   :  { %v21_v0 = vld [vmem:[%s562_s2 + $0x18] sm:$0xff]  ;;  %412 = vmatprep.subr.mxu0 %v468_v2  ;;  %v20_v3 = vld [vmem:[%s562_s2 + $0x10] sm:$0xff]  ;;  %v19_v5 = vld [vmem:[%s562_s2 + $0x8] sm:$0xff] }
   0x2   :  { %v25_v1 = vld [vmem:[%s562_s2 + $0x38] sm:$0xff]  ;;  %v24_v4 = vld [vmem:[%s562_s2 + $0x30] sm:$0xff]  ;;  %413 = vmatpush3.msra.mxu0 %v21_v0  ;;  %v23_v6 = vld [vmem:[%s562_s2 + $0x28] sm:$0xff] }
   0x3   :  { %423 = vmatprep.subr.mxu1 %v25_v1  ;;  %414 = vmatprep.subr.mxu0 %v468_v2 }
   0x4   :  { %424 = vmatpush3.msra.mxu1 %v25_v1  ;;  %415 = vmatpush3.msra.mxu0 %v20_v3 }
   0x5   :  { %425 = vmatprep.subr.mxu1 %v24_v4 }
   0x6   :  { %426 = vmatpush3.msra.mxu1 %v24_v4 }
   0x7   :  { %9 = vsyncpa [#allocation3], 0  ;;  %416 = vmatprep.subr.mxu0 %v468_v2  ;;  %v18_v7 = vld [vmem:[%s562_s2] sm:$0xff]  ;;  %vm469_vm0 = vmmov 0   ;;  %427 = vmatprep.subr.mxu1 %v23_v6  ;;  %vm35_vm1 = vcmask 261120   ;;  %v29_v11 = vld [vmem:[%s561_s1 + $0x8] sm:$0xff]  ;;  %v217_v12 = vlaneseq }
   0x8   :  { %420 = vmatprep.mubr.msk.f32.mxu0 %vm469_vm0, %v468_v2  ;;  %v22_v8 = vld [vmem:[%s562_s2 + $0x20] sm:$0xff]  ;;  %417 = vmatpush3.msra.mxu0 %v19_v5  ;;  %vm116_vm2 = vcmask 1041408   ;;  %vm118_vm3 = vcmask 1043456   ;;  %vm120_vm4 = vcmask 1045504   ;;  %v470_v30 = vmov 1983009808  }
   0x9   :  { %v30_v9 = vld [vmem:[%s560_s0] sm:$0x3]  ;;  %418 = vmatprep.subr.mxu0 %v468_v2  ;;  %428 = vmatpush3.msra.mxu1 %v23_v6  ;;  %v218_v13 = vshrl.u32 %v217_v12, 7  ;;  %v289_v14 = vand.u32 127, %v217_v12  ;;  %v215_v31 = vunpack.c.l.s4 %v470_v30  ;;  %vm255_vm5 = vcmask 254976  }
   0xa   :  { %v28_v10 = vld [vmem:[%s561_s1] sm:$0xff]  ;;  %419 = vmatpush3.msra.mxu0 %v18_v7  ;;  %429 = vmatprep.subr.mxu1 %v22_v8  ;;  %vm322_vm6 = vcmask 1041409   ;;  %vm324_vm7 = vcmask 1042434   ;;  %vm326_vm8 = vcmask 1043459   ;;  %vm328_vm9 = vcmask 1044484  }
   0xb   :  { %421 = vmatmul.mubr.msk.f32.vlgmr.msra.gmra.mxu0 %vm35_vm1, %v30_v9  ;;  %430 = vmatpush3.msra.mxu1 %v22_v8  ;;  %v530_v15 = vsub.s32 %v289_v14, %v218_v13  ;;  %v396_v16 = vld [vmem:[%s563_s3] ss:$0 sm:$0xff]  ;;  %v216_v32 = vunpack.c.0.s8 %v215_v31  ;;  %v400_v33 = vld [vmem:[%s563_s3 + $0x1] ss:$0 sm:$0xff]  ;;  %vm330_vm10 = vcmask 1045509   ;;  %vm332_vm11 = vcmask 1046534  }
   0xc   :  { %431 = vmatprep.mubr.msk.f32.mxu1 %vm35_vm1, %v28_v10  ;;  %vm334_vm12 = vcmask 1047559   ;;  %vm369_vm13 = vcmask 58368   ;;  %s471_s3 = smov [#allocation2]  }
   0xd   :  { %432 = vmatmul.mubr.msk.f32.vlgmr.msra.gmra.mxu1 %vm35_vm1, %v29_v11  ;;  %v219_v35 = vsub.s32 %v216_v32, %v218_v13  ;;  %s388_s12 = sshll.u32 %s471_s3, 4  ;;  %s389_s12 = int_to_ptr.vmem [resolvable:$true] %s388_s12 }
   0xe   :  { %s446_s13 = scalar_lea.vmem %s389_s12, 32  ;;  %p451_p1 = scmp.lt.s32.totalorder %s389_s12, %s389_s12 }
   0xf   :  { %p447_p0 = scmp.ne.s32.totalorder %s389_s12, %s446_s13  ;;  %p452_p2 = scmp.lt.s32.totalorder %s446_s13, %s446_s13 }
  0x11   :  { %p453_p3 = por %p452_p2, %p451_p1 }
  0x13   :  { %p454_p4 = pnand %p453_p3, %p447_p0 }
  0xcb   :  { %v105_v17 = vpop.f32.mrf.mxu0 }
  0xcc   :  { %v106_v18 = vadd.f32 %v396_v16, %v105_v17 }
  0xcd   :  { %v422_v19 = vpop.f32.mrf.mxu0  ;;  %v433_v22 = vpop.f32.mrf.mxu1 }
  0xce   :  { %v110_v20 = vrot.slane %v106_v18, 6  ;;  %v112_v21 = vrot.slane %v106_v18, 4  ;;  %v114_v23 = vrot.slane %v106_v18, 2 }
  0xcf   :  { %v194_v27 = vpop.f32.mrf.mxu1 }
  0xd0   :  { %v117_v24 = vsel %vm116_vm2, %v106_v18, %v110_v20 }
  0xd1   :  { %v119_v25 = vsel %vm118_vm3, %v117_v24, %v112_v21 }
  0xd2   :  { %v121_v26 = vsel %vm120_vm4, %v119_v25, %v114_v23 }
  0xd3   :  { %v200_v28 = vadd.f32 %v433_v22, %v121_v26  ;;  %v195_v29 = vadd.f32 %v194_v27, %v121_v26 }
  0xd5   :  { %438 = vtanh.f32 %v200_v28 }
  0xd6   :  { %440 = vtanh.f32 %v195_v29 }
  0xe2   :  { %v439_v34 = vpop.eup %438 }
  0xe3   :  { %v441_v36 = vpop.eup %440  ;;  %v210_v37 = vmul.f32 %v439_v34, %v400_v33 }
  0xe4   :  { %v209_v38 = vmul.f32 %v441_v36, %v400_v33 }
  0xe5   :  { %v237_v41 = vrot.slane %v210_v37, %v219_v35  ;;  %v230_v47 = vcombine.high %v210_v37, %v210_v37 }
  0xe6   :  { %v220_v39 = vrot.slane %v209_v38, %v219_v35  ;;  %v213_v40 = vcombine.high %v209_v38, %v209_v38 }
  0xe7   :  { %v245_v46 = vcombine.high %v237_v41, %v237_v41  ;;  %v244_v51 = vrot.slane %v230_v47, %v219_v35  ;;  %v268_v52 = vsel %vm255_vm5, %v237_v41, 0.0 }
  0xe8   :  { %v256_v42 = vsel %vm255_vm5, %v220_v39, 0.0  ;;  %v227_v43 = vrot.slane %v213_v40, %v219_v35  ;;  %v228_v44 = vcombine.high %v220_v39, %v220_v39 }
  0xe9   :  { %257 = vadd.xlane.f32.xlu0 %v256_v42  ;;  %v271_v49 = vsel %vm255_vm5, %v245_v46, 0.0  ;;  %v246_v54 = vcombine.high %v244_v51, %v244_v51  ;;  %v274_v55 = vsel %vm255_vm5, %v244_v51, 0.0 }
  0xea   :  { %v262_v45 = vsel %vm255_vm5, %v227_v43, 0.0  ;;  %v259_v48 = vsel %vm255_vm5, %v228_v44, 0.0  ;;  %v229_v50 = vcombine.high %v227_v43, %v227_v43 }
  0xeb   :  { %263 = vadd.xlane.f32.xlu1 %v262_v45  ;;  %v277_v56 = vsel %vm255_vm5, %v246_v54, 0.0 }
  0xec   :  { %v265_v53 = vsel %vm255_vm5, %v229_v50, 0.0 }
  0xed   :  { %260 = vadd.xlane.f32.xlu0 %v259_v48 }
  0xef   :  { %272 = vadd.xlane.f32.xlu1 %v271_v49 }
  0xf1   :  { %269 = vadd.xlane.f32.xlu0 %v268_v52 }
  0xf3   :  { %266 = vadd.xlane.f32.xlu1 %v265_v53 }
  0xf5   :  { %275 = vadd.xlane.f32.xlu0 %v274_v55 }
  0xf7   :  { %278 = vadd.xlane.f32.xlu1 %v277_v56 }
 0x172   :  { %v258_v57 = vpop.xlane.xlu0 %257 }
 0x173   :  { %v293_v62 = vrot.slane %v258_v57, %v530_v15 }
 0x174   :  { %v264_v58 = vpop.xlane.xlu1 %263 }
 0x175   :  { %v301_v1 = vrot.slane %v264_v58, %v530_v15 }
 0x176   :  { %v261_v59 = vpop.xlane.xlu0 %260 }
 0x177   :  { %v297_v60 = vrot.slane %v261_v59, %v530_v15 }
 0x178   :  { %v273_v61 = vpop.xlane.xlu1 %272 }
 0x179   :  { %v323_v0 = vsel %vm322_vm6, %v297_v60, %v293_v62  ;;  %v313_v7 = vrot.slane %v273_v61, %v530_v15 }
 0x17a   :  { %v270_v63 = vpop.xlane.xlu0 %269  ;;  %v325_v5 = vsel %vm324_vm7, %v301_v1, %v323_v0 }
 0x17b   :  { %v309_v4 = vrot.slane %v270_v63, %v530_v15 }
 0x17c   :  { %v267_v2 = vpop.xlane.xlu1 %266 }
 0x17d   :  { %v305_v3 = vrot.slane %v267_v2, %v530_v15 }
 0x17e   :  { %v276_v6 = vpop.xlane.xlu0 %275 }
 0x17f   :  { %v327_v8 = vsel %vm326_vm8, %v305_v3, %v325_v5  ;;  %v317_v9 = vrot.slane %v276_v6, %v530_v15 }
 0x180   :  { %v279_v10 = vpop.xlane.xlu1 %278  ;;  %v329_v11 = vsel %vm328_vm9, %v309_v4, %v327_v8 }
 0x181   :  { %v321_v12 = vrot.slane %v279_v10, %v530_v15  ;;  %v331_v13 = vsel %vm330_vm10, %v313_v7, %v329_v11 }
 0x182   :  { %v333_v14 = vsel %vm332_vm11, %v317_v9, %v331_v13 }
 0x183   :  { %v335_v16 = vsel %vm334_vm12, %v321_v12, %v333_v14 }
 0x184   :  { %337 = vxpose.xlu0.b32.start.end [1/1] (short) (narrow) %v335_v16, 8 }
 0x200   :  { %v353_v17 = vpop.trf.xlu0 }
 0x201   :  { %v370_v18 = vsel %vm369_vm13, %v353_v17, -inf }
 0x202   :  { %371 = vmax.xlane.f32.xlu1 %v370_v18 }
 0x28b   :  { %v372_v19 = vpop.xlane.xlu1 %371 }
 0x28c   :  { %v373_v20 = vsub.f32 %v353_v17, %v372_v19 }
 0x28e   :  { %v374_v21 = vmul.f32 1.442695, %v373_v20 }
 0x290   :  { %442 = vpow2.f32 %v374_v21 }
 0x29d   :  { %v443_v22 = vpop.eup %442 }
 0x29e   :  { %v376_v23 = vsel %vm369_vm13, %v443_v22, 0.0 }
 0x29f   :  { %377 = vadd.xlane.f32.xlu1 %v376_v23 }
 0x328   :  { %v378_v24 = vpop.xlane.xlu1 %377 }
 0x329   :  { %444 = vrcp.f32 %v378_v24 }
 0x336   :  { %v445_v15 = vpop.eup %444 }
 0x337   :  { %v380_v25 = vmul.f32 %v445_v15, %v443_v22 }
 0x339   :  { %381 = vst.msk [vmem:[#allocation2] sm:$0x3] %vm369_vm13, %v380_v25 }
 0x33a   :  { %457 = shalt.err (!%p454_p4)
}
 0x33b   :  { %391 = dma.vmem_to_hbm [thread:$0]  %s389_s12, 32, %s564_s4, [#allocation3]  }
 0x33c   :  { %466 = dma.done.wait [#allocation3], 32  }
 0x33d   :  { %467 = vsyncadd [#allocation3], 4294967264 }
 0x33e   :  { %395 = vsyncpa [#allocation3], 1 }

</bundles_post_ra>
